<compile_context>
chip_gen: v7x
topology: tpu7x:2x2x1
jax: 0.10.0
libtpu: 0.0.40
codegen_flags: <defaults>
</compile_context>

<pallas_src>
import functools

import jax
import jax.numpy as jnp
from jax.experimental import pallas as pl
from jax.experimental.pallas import tpu as pltpu


def _mlp_kernel(xt_ref, w1_ref, b1_ref, w2_ref, b2_ref, o_ref, *, matmul_dtype):
    # Layer 1 on the MXU, feature-major: (H, D) @ (D, TB) -> (H, TB), f32 acc.
    xt = xt_ref[...].astype(matmul_dtype)
    w1 = w1_ref[...].astype(matmul_dtype)
    h = jnp.tanh(
        jnp.dot(w1, xt, preferred_element_type=jnp.float32) + b1_ref[...]
    )
    # Layer 2 (H -> 1): VPU multiply + sublane reduce over H -> lane-dense (1, TB).
    y = jnp.sum(h * w2_ref[...], axis=0, keepdims=True) + b2_ref[...]
    o_ref[...] = y.astype(o_ref.dtype)


@functools.partial(
    jax.jit, static_argnames=("block_b", "matmul_dtype", "vmem_limit_bytes")
)
def small_fcn_forward(
    x, w1, b1, w2, b2, *, block_b=16384, matmul_dtype=jnp.float32,
    vmem_limit_bytes=None,
):
    B, D = x.shape
    H = w1.shape[0]

    # Wrapper-side layout plumbing (tiny): feature-major x, column-vector params.
    xt = x.T                      # (D, B): batch on lanes, fully lane-dense
    b1_c = b1.reshape(H, 1)
    w2_c = w2.reshape(H, 1)
    b2_c = b2.reshape(1, 1)

    # Batch tile: lane (last) dim of the blocks, so it must be a multiple of 128
    # unless it spans the whole batch.  Big tiles amortize per-step overhead.
    if B <= block_b:
        tb = B                                   # single grid step, full extent
    else:
        tb = max(128, (block_b // 128) * 128)    # multiple of 128
    grid = (pl.cdiv(B, tb),)

    itemsize = jnp.dtype(x.dtype).itemsize
    param_bytes = (H * D + 2 * H + 1) * jnp.dtype(w1.dtype).itemsize
    # Real dense HBM traffic of the feature-major layout.
    cost = pl.CostEstimate(
        flops=2 * B * D * H + 2 * B * H + B,
        transcendentals=B * H,
        bytes_accessed=D * B * itemsize + B * itemsize + param_bytes,
    )

    # Double-buffered x tile + output tile (+ resident params).  Only raise the
    # scoped-VMEM limit if a caller-requested tile actually needs it (keeps the
    # default limits on v5e/v6e/v7x untouched for normal tile sizes).
    vmem_needed = 2 * (D * tb + tb) * itemsize + param_bytes + (1 << 20)
    if vmem_limit_bytes is None and vmem_needed > (12 << 20):
        vmem_limit_bytes = int(min(2 * vmem_needed, 48 << 20))

    kernel = functools.partial(_mlp_kernel, matmul_dtype=matmul_dtype)
    out = pl.pallas_call(
        kernel,
        out_shape=jax.ShapeDtypeStruct((1, B), x.dtype),
        grid=grid,
        in_specs=[
            pl.BlockSpec((D, tb), lambda i: (0, i)),   # x^T: streamed batch tiles
            pl.BlockSpec((H, D), lambda i: (0, 0)),    # w1: resident
            pl.BlockSpec((H, 1), lambda i: (0, 0)),    # b1: resident
            pl.BlockSpec((H, 1), lambda i: (0, 0)),    # w2: resident
            pl.BlockSpec((1, 1), lambda i: (0, 0)),    # b2: resident
        ],
        out_specs=pl.BlockSpec((1, tb), lambda i: (0, i)),   # lane-dense output
        compiler_params=pltpu.CompilerParams(
            dimension_semantics=("parallel",),   # v7x: shard batch over both TCs
            vmem_limit_bytes=vmem_limit_bytes,
        ),
        cost_estimate=cost,
    )(xt, w1, b1_c, w2_c, b2_c)
    return out.reshape(B, 1)


def init_params(key, input_dim, hidden_dim=32, dtype=jnp.float32):
    """Deterministic init matching nn.Linear's U(-1/sqrt(fan_in), 1/sqrt(fan_in)).

    Returned in torch layout: w1 (H, D), b1 (H,), w2 (1, H), b2 (1,).
    """
    k1, k2, k3, k4 = jax.random.split(key, 4)
    bound1 = 1.0 / jnp.sqrt(input_dim)
    bound2 = 1.0 / jnp.sqrt(hidden_dim)
    w1 = jax.random.uniform(k1, (hidden_dim, input_dim), dtype, -bound1, bound1)
    b1 = jax.random.uniform(k2, (hidden_dim,), dtype, -bound1, bound1)
    w2 = jax.random.uniform(k3, (1, hidden_dim), dtype, -bound2, bound2)
    b2 = jax.random.uniform(k4, (1,), dtype, -bound2, bound2)
    return w1, b1, w2, b2


def reference_forward(x, w1, b1, w2, b2):
    """Pure-JAX reference of the PyTorch forward (torch weight layout)."""
    hp = jax.lax.Precision.HIGHEST
    h = jnp.tanh(jnp.dot(x, w1.T, precision=hp) + b1.reshape(1, -1))
    return jnp.dot(h, w2.T, precision=hp) + b2.reshape(1, 1)


if __name__ == "__main__":
    key = jax.random.PRNGKey(0)
    kx, kp = jax.random.split(key)

    batch, input_dim, hidden_dim = 8, 16, 32
    x = jax.random.normal(kx, (batch, input_dim), dtype=jnp.float32)
    w1, b1, w2, b2 = init_params(kp, input_dim, hidden_dim)

    # Small-batch path (single grid step, full-extent block).
    out = jax.block_until_ready(small_fcn_forward(x, w1, b1, w2, b2))
    assert out.shape == (batch, 1), out.shape
    ref = reference_forward(x, w1, b1, w2, b2)
    assert jnp.allclose(out, ref, atol=5e-4, rtol=5e-4), (
        f"max abs err {jnp.max(jnp.abs(out - ref))}"
    )

    # Multi-tile path (grid > 1, ragged last block, lane-dense output slab).
    big_b = 1043
    xb = jax.random.normal(kx, (big_b, input_dim), dtype=jnp.float32)
    out_b = jax.block_until_ready(
        small_fcn_forward(xb, w1, b1, w2, b2, block_b=256)
    )
    ref_b = reference_forward(xb, w1, b1, w2, b2)
    assert out_b.shape == (big_b, 1), out_b.shape
    assert jnp.allclose(out_b, ref_b, atol=5e-4, rtol=5e-4), (
        f"max abs err {jnp.max(jnp.abs(out_b - ref_b))}"
    )

    # Opt-in bf16 MXU operands / f32 accumulation (recommended on v6e/v7x).
    out_bf16 = jax.block_until_ready(
        small_fcn_forward(xb, w1, b1, w2, b2, block_b=256,
                          matmul_dtype=jnp.bfloat16)
    )
    assert jnp.allclose(out_bf16, ref_b, atol=1e-1, rtol=1e-1), (
        f"max abs err {jnp.max(jnp.abs(out_bf16 - ref_b))}"
    )

    print("KERNEL_OK")
</pallas_src>

<mosaic_0001>
module attributes {stable_mosaic.version = 11 : i64} {
  func.func @_mlp_kernel(%arg0: i32, %arg1: memref<16x8xf32, #tpu.memory_space<vmem>>, %arg2: memref<32x16xf32, #tpu.memory_space<vmem>>, %arg3: memref<32x1xf32, #tpu.memory_space<vmem>>, %arg4: memref<32x1xf32, #tpu.memory_space<vmem>>, %arg5: memref<1x1xf32, #tpu.memory_space<vmem>>, %arg6: memref<1x8xf32, #tpu.memory_space<vmem>>) attributes {dimension_semantics = [#tpu.dimension_semantics<parallel>], iteration_bounds = array<i64: 1>, scalar_prefetch = 0 : i64, scratch_operands = 0 : i64, tpu.core_type = #tpu.core_type<tc>, window_params = [{transform_indices = @transform_0, window_bounds = array<i64: 16, 8>}, {pipeline_mode = #tpu.pipeline_mode<synchronous>, transform_indices = @transform_1, window_bounds = array<i64: 32, 16>}, {pipeline_mode = #tpu.pipeline_mode<synchronous>, transform_indices = @transform_2, window_bounds = array<i64: 32, 1>}, {pipeline_mode = #tpu.pipeline_mode<synchronous>, transform_indices = @transform_3, window_bounds = array<i64: 32, 1>}, {pipeline_mode = #tpu.pipeline_mode<synchronous>, transform_indices = @transform_4, window_bounds = array<i64: 1, 1>}, {transform_indices = @transform_5, window_bounds = array<i64: 1, 8>}]} {
    %c0 = arith.constant 0 : index
    %c0_0 = arith.constant 0 : index
    %0 = vector.load %arg1[%c0, %c0_0] : memref<16x8xf32, #tpu.memory_space<vmem>>, vector<16x8xf32>
    %c0_1 = arith.constant 0 : index
    %c0_2 = arith.constant 0 : index
    %1 = vector.load %arg2[%c0_1, %c0_2] : memref<32x16xf32, #tpu.memory_space<vmem>>, vector<32x16xf32>
    %cst = arith.constant dense<0.000000e+00> : vector<32x8xf32>
    %2 = tpu.matmul %1, %0, %cst {dimension_numbers = #tpu.dot_dimension_numbers<[1], [0], [0], [1], [0, 0, 1, 1], [], []>} : vector<32x16xf32>, vector<16x8xf32>, vector<32x8xf32> -> vector<32x8xf32>
    %c0_3 = arith.constant 0 : index
    %c0_4 = arith.constant 0 : index
    %3 = vector.load %arg3[%c0_3, %c0_4] : memref<32x1xf32, #tpu.memory_space<vmem>>, vector<32x1xf32>
    %4 = vector.broadcast %3 : vector<32x1xf32> to vector<32x8xf32>
    %5 = arith.addf %2, %4 : vector<32x8xf32>
    %6 = math.tanh %5 : vector<32x8xf32>
    %c0_5 = arith.constant 0 : index
    %c0_6 = arith.constant 0 : index
    %7 = vector.load %arg4[%c0_5, %c0_6] : memref<32x1xf32, #tpu.memory_space<vmem>>, vector<32x1xf32>
    %8 = vector.broadcast %7 : vector<32x1xf32> to vector<32x8xf32>
    %9 = arith.mulf %6, %8 : vector<32x8xf32>
    %cst_7 = arith.constant dense<0.000000e+00> : vector<8xf32>
    %10 = vector.multi_reduction <add>, %9, %cst_7 [0] : vector<32x8xf32> to vector<8xf32>
    %11 = vector.shape_cast %10 : vector<8xf32> to vector<1x8xf32>
    %c0_8 = arith.constant 0 : index
    %c0_9 = arith.constant 0 : index
    %12 = vector.load %arg5[%c0_8, %c0_9] : memref<1x1xf32, #tpu.memory_space<vmem>>, vector<1x1xf32>
    %13 = vector.broadcast %12 : vector<1x1xf32> to vector<1x8xf32>
    %14 = arith.addf %11, %13 : vector<1x8xf32>
    %c0_10 = arith.constant 0 : index
    %c0_11 = arith.constant 0 : index
    %15 = vector.load %arg6[%c0_10, %c0_11] : memref<1x8xf32, #tpu.memory_space<vmem>>, vector<1x8xf32>
    tpu.vector_store %arg6[%c0_10, %c0_11], %14 {strides = array<i32>} : memref<1x8xf32, #tpu.memory_space<vmem>>, vector<1x8xf32>,
    return
  }
  func.func @transform_0(%arg0: i32) -> (i32, i32) {
    %c0_i32 = arith.constant 0 : i32
    %c0_i32_0 = arith.constant 0 : i32
    return %c0_i32, %arg0 : i32, i32
  }
  func.func @transform_1(%arg0: i32) -> (i32, i32) {
    %c0_i32 = arith.constant 0 : i32
    %c0_i32_0 = arith.constant 0 : i32
    %c0_i32_1 = arith.constant 0 : i32
    return %c0_i32, %c0_i32_0 : i32, i32
  }
  func.func @transform_2(%arg0: i32) -> (i32, i32) {
    %c0_i32 = arith.constant 0 : i32
    %c0_i32_0 = arith.constant 0 : i32
    %c0_i32_1 = arith.constant 0 : i32
    return %c0_i32, %c0_i32_0 : i32, i32
  }
  func.func @transform_3(%arg0: i32) -> (i32, i32) {
    %c0_i32 = arith.constant 0 : i32
    %c0_i32_0 = arith.constant 0 : i32
    %c0_i32_1 = arith.constant 0 : i32
    return %c0_i32, %c0_i32_0 : i32, i32
  }
  func.func @transform_4(%arg0: i32) -> (i32, i32) {
    %c0_i32 = arith.constant 0 : i32
    %c0_i32_0 = arith.constant 0 : i32
    %c0_i32_1 = arith.constant 0 : i32
    return %c0_i32, %c0_i32_0 : i32, i32
  }
  func.func @transform_5(%arg0: i32) -> (i32, i32) {
    %c0_i32 = arith.constant 0 : i32
    %c0_i32_0 = arith.constant 0 : i32
    return %c0_i32, %arg0 : i32, i32
  }
}

</mosaic_0001>

<bundles_post_ra>
// kernel: small_fcn_forward.1
= control target key start
LH: loop header
LB: loop body
LE: loop exit
PB: predicated region body
PF: predicated region fallthrough
CT: control target
= control target key end

     0   :  { %s379_s0 = inlined_call_operand.vmem [shape: f32[16,8], index: 0, kind: input, shape index: {}]   ;;  %s380_s1 = inlined_call_operand.vmem [shape: f32[32,16], index: 1, kind: input, shape index: {}]   ;;  %s381_s2 = inlined_call_operand.vmem [shape: f32[32,1], index: 2, kind: input, shape index: {}]   ;;  %s382_s3 = inlined_call_operand.vmem [shape: f32[32,1], index: 3, kind: input, shape index: {}]   ;;  %s383_s4 = inlined_call_operand.<no memory space> [shape: f32[1,1], index: 4, kind: input, shape index: {}]   ;;  %s384_s5 = inlined_call_operand.hbm [shape: f32[1,8], index: 5, kind: output, shape index: {}]  }
   0x1   :  { %v10_v0 = vstv %s383_s4 }
   0x2   :  { %11 = vst [vmem:[#allocation2] sm:$0x1] %v10_v0 }
   0x3   :  { %v23_v1 = vld [vmem:[%s379_s0] sm:$0xff]  ;;  %v24_v2 = vld [vmem:[%s379_s0 + $0x8] sm:$0xff]  ;;  %vm53_vm0 = vcmask 130048   ;;  %v27_v5 = vld [vmem:[%s380_s1 + $0x10] sm:$0xff]  ;;  %v286_v6 = vmov 0  }
   0x4   :  { %v25_v3 = vld [vmem:[%s380_s1] sm:$0xff]  ;;  %v244_v4 = vpack.c.bf16 %v24_v2, %v23_v1  ;;  %252 = vset.pattern.permute.xlu0 %v286_v6  ;;  %241 = vmatprep.mubr.msk.f32.mxu1 %vm53_vm0, %v27_v5  ;;  %v31_v8 = vld [vmem:[%s381_s2 + $0x10] sm:$0xff]  ;;  %v26_v9 = vld [vmem:[%s380_s1 + $0x8] sm:$0xff] }
   0x5   :  { %238 = vmatprep.mubr.msk.f32.mxu0 %vm53_vm0, %v25_v3  ;;  %v29_v7 = vld [vmem:[%s381_s2] sm:$0xff]  ;;  %253 = vset.pattern.permute.xlu1 %v286_v6  ;;  %v28_v10 = vld [vmem:[%s380_s1 + $0x18] sm:$0xff] }
   0x6   :  { %245 = vmatprep.subr.bf16.mxu0 %v244_v4  ;;  %248 = vmatprep.subr.bf16.mxu1 %v244_v4 }
   0x7   :  { %247 = vmatpush3.bf16.msra.mxu0 %v244_v4  ;;  %249 = vmatpush3.bf16.msra.mxu1 %v244_v4 }
   0x8   :  { %35 = vperm.xlu0 %252, %v29_v7   ;;  %45 = vperm.xlu1 %253, %v31_v8  }
   0x9   :  { %12 = vsyncpa [#allocation4], 0  ;;  %v30_v11 = vld [vmem:[%s381_s2 + $0x8] sm:$0xff]  ;;  %v32_v12 = vld [vmem:[%s381_s2 + $0x18] sm:$0xff]  ;;  %vm183_vm1 = vcmask 64512   ;;  %v203_v48 = vlaneseq  ;;  %vm208_vm2 = vcmask 57344  }
   0xa   :  { %239 = vmatmul.mubr.msk.f32.vlgmr.msra.gmra.mrb[0].mxu0 %vm53_vm0, %v26_v9  ;;  %242 = vmatmul.mubr.msk.f32.vlgmr.msra.gmra.mrb[0].mxu1 %vm53_vm0, %v28_v10  ;;  %v155_v13 = vld [vmem:[%s382_s3] sm:$0xff]  ;;  %v156_v14 = vld [vmem:[%s382_s3 + $0x8] sm:$0xff]  ;;  %v157_v15 = vld [vmem:[%s382_s3 + $0x10] sm:$0xff] }
   0xb   :  { %v158_v16 = vld [vmem:[%s382_s3 + $0x18] sm:$0xff]  ;;  %v197_v17 = vld [vmem:[#allocation2] sm:$0x1]  ;;  %v204_v51 = vshrl.u32 %v203_v48, 7  ;;  %s287_s3 = smov [#allocation3]  }
   0xc   :  { %40 = vperm.xlu0 %252, %v30_v11   ;;  %50 = vperm.xlu1 %253, %v32_v12   ;;  %s216_s19 = sshll.u32 %s287_s3, 4  ;;  %s217_s19 = int_to_ptr.vmem [resolvable:$true] %s216_s19 }
   0xd   :  { %v205_v54 = vsub.s32 0, %v204_v51  ;;  %s262_s20 = scalar_lea.vmem %s217_s19, 16  ;;  %s266_s21 = scalar_lea.vmem %s217_s19, 32 }
   0xe   :  { %p263_p0 = scmp.ne.s32.totalorder %s217_s19, %s262_s20  ;;  %p267_p1 = scmp.lt.s32.totalorder %s217_s19, %s217_s19 }
   0xf   :  { %p268_p2 = scmp.lt.s32.totalorder %s266_s21, %s262_s20 }
  0x10   :  { %161 = vperm.xlu0 %252, %v155_v13   ;;  %166 = vperm.xlu1 %253, %v156_v14  }
  0x11   :  { %p269_p3 = por %p268_p2, %p267_p1 }
  0x13   :  { %p270_p4 = pnand %p269_p3, %p263_p0 }
  0x14   :  { %171 = vperm.xlu0 %252, %v157_v15   ;;  %176 = vperm.xlu1 %253, %v158_v16  }
  0x18   :  { %200 = vperm.xlu0 %252, %v197_v17  }
  0x87   :  { %v36_v18 = vpop.permute.xlu0 %35  ;;  %v46_v19 = vpop.permute.xlu1 %45 }
  0x8b   :  { %v41_v20 = vpop.permute.xlu0 %40  ;;  %v51_v21 = vpop.permute.xlu1 %50 }
  0x8f   :  { %v162_v30 = vpop.permute.xlu0 %161  ;;  %v167_v31 = vpop.permute.xlu1 %166 }
  0x93   :  { %v172_v37 = vpop.permute.xlu0 %171  ;;  %v177_v40 = vpop.permute.xlu1 %176 }
  0x97   :  { %v201_v56 = vpop.permute.xlu0 %200 }
  0x98   :  { %v206_v58 = vrot.slane %v201_v56, %v205_v54 }
  0xdd   :  { %v240_v22 = vpop.f32.mrb[0].mxu0  ;;  %v243_v23 = vpop.f32.mrb[0].mxu1 }
  0xde   :  { %v138_v24 = vadd.f32 %v240_v22, %v41_v20  ;;  %v148_v25 = vadd.f32 %v243_v23, %v51_v21  ;;  %v132_v26 = vpop.f32.mrb[1].mxu0  ;;  %v142_v27 = vpop.f32.mrb[1].mxu1 }
  0xdf   :  { %v133_v28 = vadd.f32 %v132_v26, %v36_v18  ;;  %v143_v29 = vadd.f32 %v142_v27, %v46_v19 }
  0xe0   :  { %254 = vtanh.f32 %v138_v24 }
  0xe1   :  { %256 = vtanh.f32 %v148_v25 }
  0xe2   :  { %258 = vtanh.f32 %v133_v28 }
  0xe3   :  { %260 = vtanh.f32 %v143_v29 }
  0xea   :  { %v255_v32 = vpop.eup %254 }
  0xeb   :  { %v257_v33 = vpop.eup %256  ;;  %v180_v34 = vmul.f32 %v255_v32, %v167_v31 }
  0xec   :  { %v259_v35 = vpop.eup %258  ;;  %v182_v42 = vmul.f32 %v257_v33, %v177_v40 }
  0xed   :  { %v261_v36 = vpop.eup %260  ;;  %v185_v38 = vsel %vm183_vm1, %v180_v34, 0.0  ;;  %v179_v39 = vmul.f32 %v259_v35, %v162_v30 }
  0xee   :  { %v181_v41 = vmul.f32 %v261_v36, %v172_v37  ;;  %v189_v47 = vsel %vm183_vm1, %v182_v42, 0.0 }
  0xef   :  { %v184_v43 = vsel %vm183_vm1, %v179_v39, 0.0 }
  0xf0   :  { %v186_v44 = vadd.f32 %v185_v38, %v184_v43  ;;  %v187_v45 = vsel %vm183_vm1, %v181_v41, 0.0 }
  0xf2   :  { %v188_v46 = vadd.f32 %v187_v45, %v186_v44 }
  0xf4   :  { %v190_v49 = vadd.f32 %v189_v47, %v188_v46 }
  0xf6   :  { %v191_v50 = vrot.slane %v190_v49, 4 }
  0xf8   :  { %v192_v52 = vadd.f32 %v191_v50, %v190_v49 }
  0xfa   :  { %v193_v53 = vrot.slane %v192_v52, 2 }
  0xfc   :  { %v194_v55 = vadd.f32 %v193_v53, %v192_v52 }
  0xfe   :  { %v195_v57 = vrot.slane %v194_v55, 1 }
 0x100   :  { %v196_v59 = vadd.f32 %v195_v57, %v194_v55 }
 0x102   :  { %v207_v60 = vadd.f32 %v206_v58, %v196_v59 }
 0x104   :  { %209 = vst.msk [vmem:[#allocation3] sm:$0x1] %vm208_vm2, %v207_v60 }
 0x105   :  { %273 = shalt.err (!%p270_p4)
}
 0x106   :  { %s274_s24 = scalar_lea.hbm %s384_s5, 16 }
 0x107   :  { %p275_p5 = scmp.ne.s32.totalorder %s384_s5, %s274_s24  ;;  %p278_p6 = scmp.lt.u32.totalorder %s274_s24, %s384_s5 }
 0x109   :  { %p280_p7 = pnand %p278_p6, %p275_p5 }
 0x10b   :  { %283 = shalt.err (!%p280_p7)
}
 0x10c   :  { %219 = dma.vmem_to_hbm [thread:$0]  %s217_s19, 16, %s384_s5, [#allocation4]  }
 0x10d   :  { %284 = dma.done.wait [#allocation4], 16  }
 0x10e   :  { %285 = vsyncadd [#allocation4], 4294967280 }
 0x10f   :  { %223 = vsyncpa [#allocation4], 1 }

</bundles_post_ra>
